<compile_context>
chip_gen: v6e
topology: v6e:2x2x1
jax: 0.10.0
libtpu: 0.0.40
codegen_flags: <defaults>
</compile_context>

<pallas_src>
import functools

import jax
import jax.numpy as jnp
import numpy as np
from jax.experimental import pallas as pl
from jax.experimental.pallas import tpu as pltpu


def _mmd_tile_kernel(coef_ref, a_ref, b_ref, asq_ref, bsq_ref, aw_ref, bw_ref,
                     out_ref, *, kernel_num):
    """One (TM, TN) tile of the weighted Gaussian-kernel sum.

    coef_ref : (kernel_num,) f32 in SMEM  -- c_k = -1/(bandwidth*mul^k)
    a_ref    : (TM, Dp) f32 row block
    b_ref    : (TN, Dp) f32 col block
    asq_ref  : (TM, 1)  f32 row squared norms
    bsq_ref  : (1, TN)  f32 col squared norms
    aw_ref   : (TM, 1)  f32 row weights (+1/bs, -1/bt, 0 for padding)
    bw_ref   : (1, TN)  f32 col weights
    out_ref  : (1, 1)   f32 in SMEM -- scalar loss, resident across the grid
    """
    i = pl.program_id(0)
    j = pl.program_id(1)

    @pl.when((i == 0) & (j == 0))
    def _init():
        out_ref[0, 0] = 0.0

    a = a_ref[...]                                            # (TM, Dp)
    b = b_ref[...]                                            # (TN, Dp)

    # Gram block on the MXU; contract the feature axis of both operands directly
    # (no transpose of the column block is materialized).
    gram = jax.lax.dot_general(
        a, b, dimension_numbers=(((1,), (1,)), ((), ())),
        preferred_element_type=jnp.float32)                   # (TM, TN)

    # ||xi - xj||^2 = ||xi||^2 + ||xj||^2 - 2 xi.xj ; clamp tiny negatives.
    # (Clamp is a numerically benign divergence vs. the torch diff-based code.)
    l2 = jnp.maximum(asq_ref[...] + bsq_ref[...] - 2.0 * gram, 0.0)

    # Sum of Gaussians: exp(l2 * c_k) with scalar coefficients from SMEM, so each
    # bandwidth costs exactly one EUP exp pass over the tile (no full-tile divides).
    ksum = jnp.exp(l2 * coef_ref[0])
    for k in range(1, kernel_num):
        ksum = ksum + jnp.exp(l2 * coef_ref[k])

    # Weighted block reduction: loss += sum_ij w_i w_j K_ij for this tile.
    col_weighted = ksum * bw_ref[...]                         # (TM, TN)
    row_sum = jnp.sum(col_weighted, axis=1, keepdims=True)    # (TM, 1)
    out_ref[0, 0] += jnp.sum(row_sum * aw_ref[...])


def mmd_rbf(source, target, kernel_mul=2.0, kernel_num=5, tile=128):
    """JAX/Pallas equivalent of MMD.forward(source, target) (kernel_type='rbf')."""
    if source.shape[0] == 0 or target.shape[0] == 0:
        return jnp.asarray(0.0, dtype=source.dtype)

    bs = int(source.shape[0])
    bt = int(target.shape[0])
    out_dtype = source.dtype

    total = jnp.concatenate(
        [source.astype(jnp.float32), target.astype(jnp.float32)], axis=0)  # (N, D)
    n, d = int(total.shape[0]), int(total.shape[1])

    # ---- analytic bandwidth (wrapper side, O(N*D)) --------------------------
    # sum_ij ||xi - xj||^2 = 2*N*sum_i||xi||^2 - 2*||sum_i xi||^2
    sq_total = jnp.sum(total * total)
    col_sum = jnp.sum(total, axis=0)
    l2_sum = 2.0 * n * sq_total - 2.0 * jnp.dot(col_sum, col_sum)
    bandwidth = l2_sum / float(n * n - n)               # fix_sigma is None
    bandwidth = bandwidth / (float(kernel_mul) ** (kernel_num // 2))
    mul_pows = (float(kernel_mul) ** np.arange(kernel_num)).astype(np.float32)
    coefs = (-1.0 / (bandwidth * mul_pows)).astype(jnp.float32)     # (kernel_num,)

    # ---- block-mean weights: XX + YY - XY - YX == sum_ij w_i w_j K_ij -------
    w = jnp.concatenate([
        jnp.full((bs,), 1.0 / bs, dtype=jnp.float32),
        jnp.full((bt,), -1.0 / bt, dtype=jnp.float32)])

    # ---- pad to TPU-friendly tiles (padded rows get zero weight) ------------
    n_pad = -(-n // tile) * tile
    d_pad = -(-d // 128) * 128
    total_p = jnp.zeros((n_pad, d_pad), jnp.float32).at[:n, :d].set(total)
    w_p = jnp.zeros((n_pad,), jnp.float32).at[:n].set(w)

    row_sq = jnp.sum(total_p * total_p, axis=1, keepdims=True)      # (n_pad, 1)
    col_sq = row_sq.reshape(1, n_pad)                               # (1, n_pad)
    row_w = w_p.reshape(n_pad, 1)
    col_w = w_p.reshape(1, n_pad)

    n_tiles = n_pad // tile
    kernel = functools.partial(_mmd_tile_kernel, kernel_num=int(kernel_num))

    out = pl.pallas_call(
        kernel,
        out_shape=jax.ShapeDtypeStruct((1, 1), jnp.float32),
        grid=(n_tiles, n_tiles),
        in_specs=[
            pl.BlockSpec(memory_space=pltpu.MemorySpace.SMEM),      # coefs
            pl.BlockSpec((tile, d_pad), lambda i, j: (i, 0)),       # row block
            pl.BlockSpec((tile, d_pad), lambda i, j: (j, 0)),       # col block
            pl.BlockSpec((tile, 1), lambda i, j: (i, 0)),           # row ||x||^2
            pl.BlockSpec((1, tile), lambda i, j: (0, j)),           # col ||x||^2
            pl.BlockSpec((tile, 1), lambda i, j: (i, 0)),           # row weights
            pl.BlockSpec((1, tile), lambda i, j: (0, j)),           # col weights
        ],
        out_specs=pl.BlockSpec(memory_space=pltpu.MemorySpace.SMEM),
        # The scalar accumulator lives in SMEM across the entire grid, so both
        # grid axes must stay sequential ("arbitrary") for correctness.
        # TODO(synk): megacore-parallel variant would emit per-core partials.
        compiler_params=pltpu.CompilerParams(
            dimension_semantics=("arbitrary", "arbitrary")),
    )(coefs, total_p, total_p, row_sq, col_sq, row_w, col_w)

    return out[0, 0].astype(out_dtype)


def _mmd_reference(source, target, kernel_mul=2.0, kernel_num=5):
    """Plain-JAX transcription of the torch code, for a correctness check."""
    bs = source.shape[0]
    total = jnp.concatenate([source, target], axis=0).astype(jnp.float32)
    n = total.shape[0]
    diff = total[None, :, :] - total[:, None, :]
    l2 = jnp.sum(diff * diff, axis=2)
    bw = jnp.sum(l2) / (n * n - n)
    bw = bw / (kernel_mul ** (kernel_num // 2))
    k = sum(jnp.exp(-l2 / (bw * kernel_mul ** i)) for i in range(kernel_num))
    xx = jnp.mean(k[:bs, :bs])
    yy = jnp.mean(k[bs:, bs:])
    xy = jnp.mean(k[:bs, bs:])
    yx = jnp.mean(k[bs:, :bs])
    return xx + yy - xy - yx


if __name__ == "__main__":
    key = jax.random.PRNGKey(0)
    ks, kt = jax.random.split(key)
    B, D = 8, 32
    source = jax.random.normal(ks, (B, D), dtype=jnp.float32)
    target = jax.random.normal(kt, (B, D), dtype=jnp.float32) + 0.5

    loss = jax.jit(mmd_rbf)(source, target)
    jax.block_until_ready(loss)

    ref = _mmd_reference(source, target)
    np.testing.assert_allclose(np.asarray(loss), np.asarray(ref),
                               rtol=2e-3, atol=1e-4)

    print("KERNEL_OK")
</pallas_src>

<mosaic_0001>
module attributes {stable_mosaic.version = 11 : i64} {
  func.func @_mmd_tile_kernel(%arg0: i32, %arg1: i32, %arg2: memref<5xf32, #tpu.memory_space<smem>>, %arg3: memref<128x128xf32, #tpu.memory_space<vmem>>, %arg4: memref<128x128xf32, #tpu.memory_space<vmem>>, %arg5: memref<128x1xf32, #tpu.memory_space<vmem>>, %arg6: memref<1x128xf32, #tpu.memory_space<vmem>>, %arg7: memref<128x1xf32, #tpu.memory_space<vmem>>, %arg8: memref<1x128xf32, #tpu.memory_space<vmem>>, %arg9: memref<1x1xf32, #tpu.memory_space<smem>>) attributes {dimension_semantics = [#tpu.dimension_semantics<arbitrary>, #tpu.dimension_semantics<arbitrary>], iteration_bounds = array<i64: 1, 1>, scalar_prefetch = 0 : i64, scratch_operands = 0 : i64, tpu.core_type = #tpu.core_type<tc>, window_params = [{transform_indices = @transform_0, window_bounds = array<i64: 5>}, {transform_indices = @transform_1, window_bounds = array<i64: 128, 128>}, {transform_indices = @transform_2, window_bounds = array<i64: 128, 128>}, {transform_indices = @transform_3, window_bounds = array<i64: 128, 1>}, {transform_indices = @transform_4, window_bounds = array<i64: 1, 128>}, {transform_indices = @transform_5, window_bounds = array<i64: 128, 1>}, {transform_indices = @transform_6, window_bounds = array<i64: 1, 128>}, {transform_indices = @transform_7, window_bounds = array<i64: 1, 1>}]} {
    %c0_i32 = arith.constant 0 : i32
    %0 = arith.cmpi eq, %arg0, %c0_i32 : i32
    %c0_i32_0 = arith.constant 0 : i32
    %1 = arith.cmpi eq, %arg1, %c0_i32_0 : i32
    %2 = arith.andi %0, %1 : i1
    %3 = arith.extui %2 : i1 to i32
    %c0_i32_1 = arith.constant 0 : i32
    %4 = arith.cmpi ne, %3, %c0_i32_1 : i32
    scf.if %4 {
      %cst_22 = arith.constant 0.000000e+00 : f32
      %c0_23 = arith.constant 0 : index
      %c0_24 = arith.constant 0 : index
      %56 = memref.load %arg9[%c0_23, %c0_24] : memref<1x1xf32, #tpu.memory_space<smem>>
      memref.store %cst_22, %arg9[%c0_23, %c0_24] : memref<1x1xf32, #tpu.memory_space<smem>>
    } else {
    }
    %c0 = arith.constant 0 : index
    %c0_2 = arith.constant 0 : index
    %5 = vector.load %arg3[%c0, %c0_2] : memref<128x128xf32, #tpu.memory_space<vmem>>, vector<128x128xf32>
    %c0_3 = arith.constant 0 : index
    %c0_4 = arith.constant 0 : index
    %6 = vector.load %arg4[%c0_3, %c0_4] : memref<128x128xf32, #tpu.memory_space<vmem>>, vector<128x128xf32>
    %cst = arith.constant dense<0.000000e+00> : vector<128x128xf32>
    %7 = tpu.matmul %5, %6, %cst {dimension_numbers = #tpu.dot_dimension_numbers<[1], [1], [0], [0], [0, 0, 1, 0], [], []>} : vector<128x128xf32>, vector<128x128xf32>, vector<128x128xf32> -> vector<128x128xf32>
    %c0_5 = arith.constant 0 : index
    %c0_6 = arith.constant 0 : index
    %8 = vector.load %arg5[%c0_5, %c0_6] : memref<128x1xf32, #tpu.memory_space<vmem>>, vector<128x1xf32>
    %c0_7 = arith.constant 0 : index
    %c0_8 = arith.constant 0 : index
    %9 = vector.load %arg6[%c0_7, %c0_8] : memref<1x128xf32, #tpu.memory_space<vmem>>, vector<1x128xf32>
    %10 = vector.broadcast %8 : vector<128x1xf32> to vector<128x128xf32>
    %11 = vector.broadcast %9 : vector<1x128xf32> to vector<128x128xf32>
    %12 = arith.addf %10, %11 : vector<128x128xf32>
    %cst_9 = arith.constant 2.000000e+00 : f32
    %13 = vector.broadcast %cst_9 : f32 to vector<128x128xf32>
    %14 = arith.mulf %13, %7 : vector<128x128xf32>
    %15 = arith.subf %12, %14 : vector<128x128xf32>
    %cst_10 = arith.constant 0.000000e+00 : f32
    %16 = vector.broadcast %cst_10 : f32 to vector<128x128xf32>
    %17 = arith.maximumf %15, %16 : vector<128x128xf32>
    %c0_11 = arith.constant 0 : index
    %18 = memref.load %arg2[%c0_11] : memref<5xf32, #tpu.memory_space<smem>>
    %19 = vector.broadcast %18 : f32 to vector<128x128xf32>
    %20 = arith.mulf %17, %19 : vector<128x128xf32>
    %21 = math.exp %20 : vector<128x128xf32>
    %c1 = arith.constant 1 : index
    %22 = memref.load %arg2[%c1] : memref<5xf32, #tpu.memory_space<smem>>
    %23 = vector.broadcast %22 : f32 to vector<128x128xf32>
    %24 = arith.mulf %17, %23 : vector<128x128xf32>
    %25 = math.exp %24 : vector<128x128xf32>
    %26 = arith.addf %21, %25 : vector<128x128xf32>
    %c2 = arith.constant 2 : index
    %27 = memref.load %arg2[%c2] : memref<5xf32, #tpu.memory_space<smem>>
    %28 = vector.broadcast %27 : f32 to vector<128x128xf32>
    %29 = arith.mulf %17, %28 : vector<128x128xf32>
    %30 = math.exp %29 : vector<128x128xf32>
    %31 = arith.addf %26, %30 : vector<128x128xf32>
    %c3 = arith.constant 3 : index
    %32 = memref.load %arg2[%c3] : memref<5xf32, #tpu.memory_space<smem>>
    %33 = vector.broadcast %32 : f32 to vector<128x128xf32>
    %34 = arith.mulf %17, %33 : vector<128x128xf32>
    %35 = math.exp %34 : vector<128x128xf32>
    %36 = arith.addf %31, %35 : vector<128x128xf32>
    %c4 = arith.constant 4 : index
    %37 = memref.load %arg2[%c4] : memref<5xf32, #tpu.memory_space<smem>>
    %38 = vector.broadcast %37 : f32 to vector<128x128xf32>
    %39 = arith.mulf %17, %38 : vector<128x128xf32>
    %40 = math.exp %39 : vector<128x128xf32>
    %41 = arith.addf %36, %40 : vector<128x128xf32>
    %c0_12 = arith.constant 0 : index
    %c0_13 = arith.constant 0 : index
    %42 = vector.load %arg8[%c0_12, %c0_13] : memref<1x128xf32, #tpu.memory_space<vmem>>, vector<1x128xf32>
    %43 = vector.broadcast %42 : vector<1x128xf32> to vector<128x128xf32>
    %44 = arith.mulf %41, %43 : vector<128x128xf32>
    %cst_14 = arith.constant dense<0.000000e+00> : vector<128xf32>
    %45 = vector.multi_reduction <add>, %44, %cst_14 [1] : vector<128x128xf32> to vector<128xf32>
    %46 = vector.shape_cast %45 : vector<128xf32> to vector<128x1xf32>
    %c0_15 = arith.constant 0 : index
    %c0_16 = arith.constant 0 : index
    %47 = memref.load %arg9[%c0_15, %c0_16] : memref<1x1xf32, #tpu.memory_space<smem>>
    %c0_17 = arith.constant 0 : index
    %c0_18 = arith.constant 0 : index
    %48 = vector.load %arg7[%c0_17, %c0_18] : memref<128x1xf32, #tpu.memory_space<vmem>>, vector<128x1xf32>
    %49 = arith.mulf %46, %48 : vector<128x1xf32>
    %50 = vector.shape_cast %49 : vector<128x1xf32> to vector<1x128x1xf32>
    %cst_19 = arith.constant dense<0.000000e+00> : vector<1xf32>
    %51 = vector.multi_reduction <add>, %50, %cst_19 [1, 2] : vector<1x128x1xf32> to vector<1xf32>
    %52 = vector.shape_cast %51 : vector<1xf32> to vector<1x1x1xf32>
    %53 = vector.extract %52[0, 0, 0] : f32 from vector<1x1x1xf32>
    %54 = arith.addf %47, %53 : f32
    %c0_20 = arith.constant 0 : index
    %c0_21 = arith.constant 0 : index
    %55 = memref.load %arg9[%c0_20, %c0_21] : memref<1x1xf32, #tpu.memory_space<smem>>
    memref.store %54, %arg9[%c0_20, %c0_21] : memref<1x1xf32, #tpu.memory_space<smem>>
    return
  }
  func.func @transform_0(%arg0: i32, %arg1: i32) -> i32 {
    %c0_i32 = arith.constant 0 : i32
    %c0_i32_0 = arith.constant 0 : i32
    return %c0_i32 : i32
  }
  func.func @transform_1(%arg0: i32, %arg1: i32) -> (i32, i32) {
    %c0_i32 = arith.constant 0 : i32
    %c0_i32_0 = arith.constant 0 : i32
    return %arg0, %c0_i32 : i32, i32
  }
  func.func @transform_2(%arg0: i32, %arg1: i32) -> (i32, i32) {
    %c0_i32 = arith.constant 0 : i32
    %c0_i32_0 = arith.constant 0 : i32
    return %arg1, %c0_i32 : i32, i32
  }
  func.func @transform_3(%arg0: i32, %arg1: i32) -> (i32, i32) {
    %c0_i32 = arith.constant 0 : i32
    %c0_i32_0 = arith.constant 0 : i32
    return %arg0, %c0_i32 : i32, i32
  }
  func.func @transform_4(%arg0: i32, %arg1: i32) -> (i32, i32) {
    %c0_i32 = arith.constant 0 : i32
    %c0_i32_0 = arith.constant 0 : i32
    return %c0_i32, %arg1 : i32, i32
  }
  func.func @transform_5(%arg0: i32, %arg1: i32) -> (i32, i32) {
    %c0_i32 = arith.constant 0 : i32
    %c0_i32_0 = arith.constant 0 : i32
    return %arg0, %c0_i32 : i32, i32
  }
  func.func @transform_6(%arg0: i32, %arg1: i32) -> (i32, i32) {
    %c0_i32 = arith.constant 0 : i32
    %c0_i32_0 = arith.constant 0 : i32
    return %c0_i32, %arg1 : i32, i32
  }
  func.func @transform_7(%arg0: i32, %arg1: i32) -> (i32, i32) {
    %c0_i32 = arith.constant 0 : i32
    %c0_i32_0 = arith.constant 0 : i32
    %c0_i32_1 = arith.constant 0 : i32
    return %c0_i32, %c0_i32_0 : i32, i32
  }
}

</mosaic_0001>

<bundles_post_ra>
// kernel: mmd_rbf.1
= control target key start
LH: loop header
LB: loop body
LE: loop exit
PB: predicated region body
PF: predicated region fallthrough
CT: control target
= control target key end

     0   :  { %12 = vsyncpa [#allocation4], 0  ;;  %s1754_s0 = inlined_call_operand.vmem [shape: f32[5], index: 0, kind: input, shape index: {}]   ;;  %s1755_s1 = inlined_call_operand.vmem [shape: f32[128,128], index: 1, kind: input, shape index: {}, may-alias: {1,2}]   ;;  %s1756_s2 = inlined_call_operand.vmem [shape: f32[128,128], index: 2, kind: input, shape index: {}, may-alias: {1,2}]   ;;  %s1757_s3 = inlined_call_operand.vmem [shape: f32[128,1], index: 3, kind: input, shape index: {}]   ;;  %s1758_s4 = inlined_call_operand.vmem [shape: f32[1,128], index: 4, kind: input, shape index: {}]   ;;  %s1759_s5 = inlined_call_operand.vmem [shape: f32[128,1], index: 5, kind: input, shape index: {}]   ;;  %s1760_s6 = inlined_call_operand.vmem [shape: f32[1,128], index: 6, kind: input, shape index: {}]   ;;  %s1761_s7 = inlined_call_operand.hbm [shape: f32[1,1], index: 7, kind: output, shape index: {}]  }
   0x1   :  { %13 = vsyncpa [#allocation3], 0  ;;  %s20_s26 = sshll.u32 %s1754_s0, 4  ;;  %s21_s26 = int_to_ptr.vmem [resolvable:$true] %s20_s26 }
   0x2   :  { %s1146_s27 = scalar_lea.vmem %s21_s26, 16  ;;  %p1151_p1 = scmp.lt.s32.totalorder %s21_s26, %s21_s26 }
   0x3   :  { %p1147_p0 = scmp.ne.s32.totalorder %s21_s26, %s1146_s27  ;;  %p1152_p2 = scmp.lt.s32.totalorder %s1146_s27, %s1146_s27 }
   0x5   :  { %p1153_p3 = por %p1152_p2, %p1151_p1 }
   0x7   :  { %p1154_p4 = pnand %p1153_p3, %p1147_p0 }
   0x9   :  { %1157 = shalt.err (!%p1154_p4)
}
   0xa   :  { %s1170_s28 = smov [#allocation2]  }
   0xb   :  { %23 = dma.vmem_to_smem %s21_s26, 16, %s1170_s28, [#allocation4]  }
   0xc   :  { %1166 = dma.done.wait [#allocation4], 16  }
   0xd   :  { %1167 = vsyncadd [#allocation4], 4294967280 }
   0xe   :  { %39 = sfence }
   0xf   :  { %v79_v0 = vld [vmem:[%s1756_s2 + $0x78] sm:$0xff]  ;;  %v78_v1 = vld [vmem:[%s1756_s2 + $0x70] sm:$0xff]  ;;  %v77_v2 = vld [vmem:[%s1756_s2 + $0x68] sm:$0xff]  ;;  %v1171_v3 = vmov 0   ;;  %s392_s28 = sld [smem:[#allocation2]]  ;;  %vm794_vm0 = vcmask 7168  }
  0x10   :  { %890 = vmatprep.subr.mxu0 %v79_v0  ;;  %946 = vmatprep.subr.mxu1 %v79_v0  ;;  %v48_v4 = vld [vmem:[%s1755_s1] sm:$0xff]  ;;  %v227_v8 = vld [vmem:[%s1757_s3 + $0x10] sm:$0xff]  ;;  %v75_v9 = vld [vmem:[%s1756_s2 + $0x58] sm:$0xff]  ;;  %s853_s29 = sld [smem:[#allocation2 + $0x1]]  ;;  %s1172_s10 = smov [#allocation5]  }
  0x11   :  { %891 = vmatpush3.xpose.msra.mxu0 %v79_v0  ;;  %962 = vmatpush3.xpose.msra.mxu1 %v79_v0  ;;  %v56_v5 = vld [vmem:[%s1755_s1 + $0x40] sm:$0xff]  ;;  %v226_v10 = vld [vmem:[%s1757_s3 + $0x8] sm:$0xff]  ;;  %v228_v11 = vld [vmem:[%s1757_s3 + $0x18] sm:$0xff]  ;;  %s854_s30 = sld [smem:[#allocation2 + $0x2]] }
  0x12   :  { %892 = vmatprep.subr.mxu0 %v78_v1  ;;  %947 = vmatprep.subr.mxu1 %v78_v1  ;;  %v76_v6 = vld [vmem:[%s1756_s2 + $0x60] sm:$0xff]  ;;  %v74_v12 = vld [vmem:[%s1756_s2 + $0x50] sm:$0xff]  ;;  %v230_v14 = vld [vmem:[%s1757_s3 + $0x28] sm:$0xff] }
  0x13   :  { %984 = vset.pattern.permute.xlu0 %v1171_v3  ;;  %985 = vset.pattern.permute.xlu1 %v1171_v3  ;;  %v225_v7 = vld [vmem:[%s1757_s3] sm:$0xff]  ;;  %v73_v15 = vld [vmem:[%s1756_s2 + $0x48] sm:$0xff]  ;;  %v231_v16 = vld [vmem:[%s1757_s3 + $0x30] sm:$0xff] }
  0x14   :  { %922 = vmatprep.mubr.f32.mxu0 %v48_v4  ;;  %934 = vmatprep.mubr.f32.mxu1 %v56_v5  ;;  %v229_v13 = vld [vmem:[%s1757_s3 + $0x20] sm:$0xff]  ;;  %v232_v17 = vld [vmem:[%s1757_s3 + $0x38] sm:$0xff]  ;;  %v234_v20 = vld [vmem:[%s1757_s3 + $0x48] sm:$0xff] }
  0x15   :  { %893 = vmatpush3.xpose.msra.mxu0 %v78_v1  ;;  %963 = vmatpush3.xpose.msra.mxu1 %v78_v1  ;;  %v72_v18 = vld [vmem:[%s1756_s2 + $0x40] sm:$0xff]  ;;  %v71_v21 = vld [vmem:[%s1756_s2 + $0x38] sm:$0xff]  ;;  %v235_v22 = vld [vmem:[%s1757_s3 + $0x50] sm:$0xff]  ;;  %v1369_v3 = vstv %s392_s28 }
  0x16   :  { %894 = vmatprep.subr.mxu0 %v77_v2  ;;  %948 = vmatprep.subr.mxu1 %v77_v2  ;;  %v233_v19 = vld [vmem:[%s1757_s3 + $0x40] sm:$0xff]  ;;  %v236_v23 = vld [vmem:[%s1757_s3 + $0x58] sm:$0xff]  ;;  %v70_v24 = vld [vmem:[%s1756_s2 + $0x30] sm:$0xff] }
  0x17   :  { %244 = vperm.xlu0 %984, %v225_v7   ;;  %254 = vperm.xlu1 %985, %v227_v8   ;;  %v237_v25 = vld [vmem:[%s1757_s3 + $0x60] sm:$0xff]  ;;  %v238_v26 = vld [vmem:[%s1757_s3 + $0x68] sm:$0xff]  ;;  %v239_v28 = vld [vmem:[%s1757_s3 + $0x70] sm:$0xff]  ;;  %v1372_v7 = vstv %s853_s29 }
  0x18   :  { %v69_v27 = vld [vmem:[%s1756_s2 + $0x28] sm:$0xff]  ;;  %v240_v29 = vld [vmem:[%s1757_s3 + $0x78] sm:$0xff]  ;;  %v68_v30 = vld [vmem:[%s1756_s2 + $0x20] sm:$0xff] }
  0x19   :  { %895 = vmatpush3.xpose.msra.mxu0 %v77_v2  ;;  %964 = vmatpush3.xpose.msra.mxu1 %v77_v2  ;;  %v67_v31 = vld [vmem:[%s1756_s2 + $0x18] sm:$0xff]  ;;  %v66_v32 = vld [vmem:[%s1756_s2 + $0x10] sm:$0xff]  ;;  %v65_v33 = vld [vmem:[%s1756_s2 + $0x8] sm:$0xff] }
  0x1a   :  { %896 = vmatprep.subr.mxu0 %v76_v6  ;;  %949 = vmatprep.subr.mxu1 %v76_v6  ;;  %v64_v34 = vld [vmem:[%s1756_s2] sm:$0xff]  ;;  %v49_v35 = vld [vmem:[%s1755_s1 + $0x8] sm:$0xff]  ;;  %v50_v37 = vld [vmem:[%s1755_s1 + $0x10] sm:$0xff]  ;;  %s856_s2 = sld [smem:[#allocation2 + $0x4]] }
  0x1b   :  { %249 = vperm.xlu0 %984, %v226_v10   ;;  %259 = vperm.xlu1 %985, %v228_v11   ;;  %v57_v36 = vld [vmem:[%s1755_s1 + $0x48] sm:$0xff]  ;;  %v58_v38 = vld [vmem:[%s1755_s1 + $0x50] sm:$0xff]  ;;  %v51_v39 = vld [vmem:[%s1755_s1 + $0x18] sm:$0xff] }
  0x1c   :  { %v59_v40 = vld [vmem:[%s1755_s1 + $0x58] sm:$0xff]  ;;  %v52_v41 = vld [vmem:[%s1755_s1 + $0x20] sm:$0xff]  ;;  %v53_v43 = vld [vmem:[%s1755_s1 + $0x28] sm:$0xff] }
  0x1d   :  { %897 = vmatpush3.xpose.msra.mxu0 %v76_v6  ;;  %965 = vmatpush3.xpose.msra.mxu1 %v76_v6  ;;  %v60_v42 = vld [vmem:[%s1755_s1 + $0x60] sm:$0xff]  ;;  %v61_v44 = vld [vmem:[%s1755_s1 + $0x68] sm:$0xff]  ;;  %v54_v45 = vld [vmem:[%s1755_s1 + $0x30] sm:$0xff] }
  0x1e   :  { %898 = vmatprep.subr.mxu0 %v75_v9  ;;  %950 = vmatprep.subr.mxu1 %v75_v9  ;;  %v62_v46 = vld [vmem:[%s1755_s1 + $0x70] sm:$0xff]  ;;  %v55_v47 = vld [vmem:[%s1755_s1 + $0x38] sm:$0xff]  ;;  %v1365_v55 = vld [vmem:[%s1758_s4] ss:$0 sm:$0xff] }
  0x1f   :  { %264 = vperm.xlu0 %984, %v229_v13   ;;  %269 = vperm.xlu1 %985, %v230_v14   ;;  %v63_v48 = vld [vmem:[%s1755_s1 + $0x78] sm:$0xff]  ;;  %s855_s1 = sld [smem:[#allocation2 + $0x3]] }
  0x20   :  { %v1380_v14 = vstv %s856_s2 }
  0x21   :  { %899 = vmatpush3.xpose.msra.mxu0 %v75_v9  ;;  %966 = vmatpush3.xpose.msra.mxu1 %v75_v9  ;;  %v1374_v9 = vstv %s854_s30 }
  0x22   :  { %900 = vmatprep.subr.mxu0 %v74_v12  ;;  %951 = vmatprep.subr.mxu1 %v74_v12 }
  0x23   :  { %274 = vperm.xlu0 %984, %v231_v16   ;;  %279 = vperm.xlu1 %985, %v232_v17  }
  0x25   :  { %901 = vmatpush3.xpose.msra.mxu0 %v74_v12  ;;  %967 = vmatpush3.xpose.msra.mxu1 %v74_v12  ;;  %v1377_v11 = vstv %s855_s1 }
  0x26   :  { %902 = vmatprep.subr.mxu0 %v73_v15  ;;  %952 = vmatprep.subr.mxu1 %v73_v15 }
  0x27   :  { %284 = vperm.xlu0 %984, %v233_v19   ;;  %289 = vperm.xlu1 %985, %v234_v20  }
  0x29   :  { %903 = vmatpush3.xpose.msra.mxu0 %v73_v15  ;;  %968 = vmatpush3.xpose.msra.mxu1 %v73_v15 }
  0x2a   :  { %904 = vmatprep.subr.mxu0 %v72_v18  ;;  %953 = vmatprep.subr.mxu1 %v72_v18 }
  0x2b   :  { %294 = vperm.xlu0 %984, %v235_v22   ;;  %299 = vperm.xlu1 %985, %v236_v23  }
  0x2d   :  { %905 = vmatpush3.xpose.msra.mxu0 %v72_v18  ;;  %969 = vmatpush3.xpose.msra.mxu1 %v72_v18 }
  0x2e   :  { %906 = vmatprep.subr.mxu0 %v71_v21  ;;  %954 = vmatprep.subr.mxu1 %v71_v21 }
  0x2f   :  { %304 = vperm.xlu0 %984, %v237_v25   ;;  %309 = vperm.xlu1 %985, %v238_v26  }
  0x31   :  { %907 = vmatpush3.xpose.msra.mxu0 %v71_v21  ;;  %970 = vmatpush3.xpose.msra.mxu1 %v71_v21 }
  0x32   :  { %908 = vmatprep.subr.mxu0 %v70_v24  ;;  %955 = vmatprep.subr.mxu1 %v70_v24 }
  0x33   :  { %314 = vperm.xlu0 %984, %v239_v28   ;;  %319 = vperm.xlu1 %985, %v240_v29  }
  0x35   :  { %909 = vmatpush3.xpose.msra.mxu0 %v70_v24  ;;  %971 = vmatpush3.xpose.msra.mxu1 %v70_v24 }
  0x36   :  { %910 = vmatprep.subr.mxu0 %v69_v27  ;;  %956 = vmatprep.subr.mxu1 %v69_v27 }
  0x39   :  { %911 = vmatpush3.xpose.msra.mxu0 %v69_v27  ;;  %972 = vmatpush3.xpose.msra.mxu1 %v69_v27 }
  0x3a   :  { %912 = vmatprep.subr.mxu0 %v68_v30  ;;  %957 = vmatprep.subr.mxu1 %v68_v30 }
  0x3d   :  { %913 = vmatpush3.xpose.msra.mxu0 %v68_v30  ;;  %973 = vmatpush3.xpose.msra.mxu1 %v68_v30 }
  0x3e   :  { %914 = vmatprep.subr.mxu0 %v67_v31  ;;  %958 = vmatprep.subr.mxu1 %v67_v31 }
  0x41   :  { %915 = vmatpush3.xpose.msra.mxu0 %v67_v31  ;;  %974 = vmatpush3.xpose.msra.mxu1 %v67_v31 }
  0x42   :  { %916 = vmatprep.subr.mxu0 %v66_v32  ;;  %959 = vmatprep.subr.mxu1 %v66_v32 }
  0x45   :  { %917 = vmatpush3.xpose.msra.mxu0 %v66_v32  ;;  %975 = vmatpush3.xpose.msra.mxu1 %v66_v32 }
  0x46   :  { %918 = vmatprep.subr.mxu0 %v65_v33  ;;  %960 = vmatprep.subr.mxu1 %v65_v33 }
  0x49   :  { %919 = vmatpush3.xpose.msra.mxu0 %v65_v33  ;;  %976 = vmatpush3.xpose.msra.mxu1 %v65_v33 }
  0x4a   :  { %920 = vmatprep.subr.mxu0 %v64_v34  ;;  %961 = vmatprep.subr.mxu1 %v64_v34 }
  0x4d   :  { %921 = vmatpush3.xpose.msra.mxu0 %v64_v34  ;;  %977 = vmatpush3.xpose.msra.mxu1 %v64_v34 }
  0x50   :  { %923 = vmatmul.mubr.f32.vlgmr.msra.gmra.mxu0 %v49_v35  ;;  %935 = vmatmul.mubr.f32.vlgmr.msra.gmra.mxu1 %v57_v36 }
  0x51   :  { %925 = vmatprep.mubr.f32.mxu0 %v50_v37  ;;  %937 = vmatprep.mubr.f32.mxu1 %v58_v38 }
  0x54   :  { %926 = vmatmul.mubr.f32.gmra.mxu0 %v51_v39  ;;  %938 = vmatmul.mubr.f32.gmra.mxu1 %v59_v40 }
  0x55   :  { %928 = vmatprep.mubr.f32.mxu0 %v52_v41  ;;  %940 = vmatprep.mubr.f32.mxu1 %v60_v42 }
  0x58   :  { %929 = vmatmul.mubr.f32.gmra.mxu0 %v53_v43  ;;  %941 = vmatmul.mubr.f32.gmra.mxu1 %v61_v44 }
  0x59   :  { %931 = vmatprep.mubr.f32.mxu0 %v54_v45  ;;  %943 = vmatprep.mubr.f32.mxu1 %v62_v46 }
  0x5c   :  { %932 = vmatmul.mubr.f32.gmra.mxu0 %v55_v47  ;;  %944 = vmatmul.mubr.f32.gmra.mxu1 %v63_v48 }
  0x92   :  { %v255_v49 = vpop.permute.xlu1 %254  ;;  %v245_v51 = vpop.permute.xlu0 %244 }
  0x93   :  { %v328_v5 = vadd.f32 %v1365_v55, %v245_v51  ;;  %v1387_v24 = vadd.f32 %v1365_v55, %v255_v49 }
  0x96   :  { %v260_v50 = vpop.permute.xlu1 %259  ;;  %v250_v53 = vpop.permute.xlu0 %249 }
  0x97   :  { %v329_v57 = vadd.f32 %v1365_v55, %v250_v53  ;;  %v331_v25 = vadd.f32 %v1365_v55, %v260_v50 }
  0x9a   :  { %v270_v52 = vpop.permute.xlu1 %269  ;;  %v265_v56 = vpop.permute.xlu0 %264 }
  0x9b   :  { %v1392_v29 = vadd.f32 %v1365_v55, %v265_v56  ;;  %v1396_v33 = vadd.f32 %v1365_v55, %v270_v52 }
  0x9e   :  { %v1360_v54 = vpop.permute.xlu1 %279  ;;  %v275_v1 = vpop.permute.xlu0 %274 }
  0xa2   :  { %v290_v58 = vpop.permute.xlu1 %289  ;;  %v285_v16 = vpop.permute.xlu0 %284 }
  0xa3   :  { %v337_v59 = vadd.f32 %v1365_v55, %v290_v58  ;;  %v336_v19 = vadd.f32 %v1365_v55, %v285_v16 }
  0xa6   :  { %v300_v38 = vpop.permute.xlu1 %299  ;;  %v295_v51 = vpop.permute.xlu0 %294 }
  0xa7   :  { %v339_v42 = vadd.f32 %v1365_v55, %v300_v38 }
 0x110   :  { %v924_v60 = vpop.f32.mrf.mxu0  ;;  %v936_v61 = vpop.f32.mrf.mxu1 }
 0x111   :  { %v345_v62 = vmul.f32 2.0, %v924_v60  ;;  %v353_v63 = vmul.f32 2.0, %v936_v61  ;;  %v1411_v60 = vadd.f32 %v1365_v55, %v1360_v54 }
 0x112   :  { %v146_v0 = vpop.f32.mrf.mxu0  ;;  %v186_v12 = vpop.f32.mrf.mxu1 }
 0x113   :  { %v361_v2 = vsub.f32 %v329_v57, %v345_v62  ;;  %v369_v4 = vsub.f32 %v337_v59, %v353_v63  ;;  %v344_v8 = vmul.f32 2.0, %v146_v0  ;;  %v352_v21 = vmul.f32 2.0, %v186_v12  ;;  %v305_v12 = vpop.permute.xlu0 %304 }
 0x114   :  { %v927_v28 = vpop.f32.mrf.mxu0  ;;  %v939_v37 = vpop.f32.mrf.mxu1  ;;  %v1406_v57 = vadd.f32 %v1365_v55, %v275_v1 }
 0x115   :  { %v377_v6 = vmax.f32 %v361_v2, 0.0  ;;  %v385_v15 = vmax.f32 %v369_v4, 0.0  ;;  %v360_v18 = vsub.f32 %v328_v5, %v344_v8  ;;  %v368_v36 = vsub.f32 %v336_v19, %v352_v21 }
 0x116   :  { %v347_v41 = vmul.f32 2.0, %v927_v28  ;;  %v355_v47 = vmul.f32 2.0, %v939_v37  ;;  %v156_v4 = vpop.f32.mrf.mxu0  ;;  %v1417_v8 = vadd.f32 %v1365_v55, %v295_v51 }
 0x117   :  { %v395_v10 = vmul.f32 %v1369_v3, %v377_v6  ;;  %v445_v13 = vmul.f32 %v1372_v7, %v377_v6  ;;  %v511_v17 = vmul.f32 %v1374_v9, %v377_v6  ;;  %v577_v20 = vmul.f32 %v1377_v11, %v377_v6 }
 0x118   :  { %v643_v23 = vmul.f32 %v1380_v14, %v377_v6  ;;  %v403_v27 = vmul.f32 %v1369_v3, %v385_v15  ;;  %v453_v31 = vmul.f32 %v1372_v7, %v385_v15  ;;  %v376_v32 = vmax.f32 %v360_v18, 0.0  ;;  %v310_v18 = vpop.permute.xlu1 %309 }
 0x119   :  { %v412_v22 = vmul.f32 1.442695, %v395_v10  ;;  %v462_v26 = vmul.f32 1.442695, %v445_v13  ;;  %v528_v30 = vmul.f32 1.442695, %v511_v17  ;;  %v519_v35 = vmul.f32 %v1374_v9, %v385_v15  ;;  %v196_v17 = vpop.f32.mrf.mxu1 }
 0x11a   :  { %v594_v34 = vmul.f32 1.442695, %v577_v20  ;;  %v660_v39 = vmul.f32 1.442695, %v643_v23  ;;  %v585_v40 = vmul.f32 %v1377_v11, %v385_v15  ;;  %v428_v43 = vmul.f32 1.442695, %v403_v27 }
 0x11b   :  { %986 = vpow2.f32 %v412_v22  ;;  %v651_v44 = vmul.f32 %v1380_v14, %v385_v15  ;;  %v478_v45 = vmul.f32 1.442695, %v453_v31  ;;  %v394_v46 = vmul.f32 %v1369_v3, %v376_v32 }
 0x11c   :  { %988 = vpow2.f32 %v462_v26  ;;  %v544_v48 = vmul.f32 1.442695, %v519_v35  ;;  %v444_v49 = vmul.f32 %v1372_v7, %v376_v32  ;;  %v384_v50 = vmax.f32 %v368_v36, 0.0 }
 0x11d   :  { %990 = vpow2.f32 %v528_v30  ;;  %v610_v52 = vmul.f32 1.442695, %v585_v40  ;;  %v510_v53 = vmul.f32 %v1374_v9, %v376_v32  ;;  %v363_v56 = vsub.f32 %v331_v25, %v347_v41  ;;  %v315_v41 = vpop.permute.xlu0 %314 }
 0x11e   :  { %992 = vpow2.f32 %v594_v34  ;;  %v676_v58 = vmul.f32 1.442695, %v651_v44  ;;  %v576_v59 = vmul.f32 %v1377_v11, %v376_v32  ;;  %v410_v61 = vmul.f32 1.442695, %v394_v46 }
 0x11f   :  { %994 = vpow2.f32 %v660_v39  ;;  %v642_v62 = vmul.f32 %v1380_v14, %v376_v32  ;;  %v460_v63 = vmul.f32 1.442695, %v444_v49  ;;  %v402_v0 = vmul.f32 %v1369_v3, %v384_v50 }
 0x120   :  { %996 = vpow2.f32 %v428_v43  ;;  %v371_v2 = vsub.f32 %v339_v42, %v355_v47  ;;  %v526_v1 = vmul.f32 1.442695, %v510_v53  ;;  %v452_v5 = vmul.f32 %v1372_v7, %v384_v50 }
 0x121   :  { %998 = vpow2.f32 %v478_v45  ;;  %v379_v6 = vmax.f32 %v363_v56, 0.0  ;;  %v592_v54 = vmul.f32 1.442695, %v576_v59  ;;  %v518_v10 = vmul.f32 %v1374_v9, %v384_v50  ;;  %v930_v45 = vpop.f32.mrf.mxu0 }
 0x122   :  { %1000 = vpow2.f32 %v544_v48  ;;  %v658_v13 = vmul.f32 1.442695, %v642_v62  ;;  %v584_v15 = vmul.f32 %v1377_v11, %v384_v50  ;;  %v346_v16 = vmul.f32 2.0, %v156_v4  ;;  %v320_v48 = vpop.permute.xlu1 %319  ;;  %v942_v4 = vpop.f32.mrf.mxu1 }
 0x123   :  { %1002 = vpow2.f32 %v610_v52  ;;  %v426_v19 = vmul.f32 1.442695, %v402_v0  ;;  %v650_v20 = vmul.f32 %v1380_v14, %v384_v50  ;;  %v387_v21 = vmax.f32 %v371_v2, 0.0 }
 0x124   :  { %1004 = vpow2.f32 %v676_v58  ;;  %v476_v22 = vmul.f32 1.442695, %v452_v5  ;;  %v397_v23 = vmul.f32 %v1369_v3, %v379_v6  ;;  %v447_v25 = vmul.f32 %v1372_v7, %v379_v6 }
 0x125   :  { %1006 = vpow2.f32 %v410_v61  ;;  %v542_v27 = vmul.f32 1.442695, %v518_v10  ;;  %v513_v28 = vmul.f32 %v1374_v9, %v379_v6  ;;  %v354_v30 = vmul.f32 2.0, %v196_v17 }
 0x126   :  { %1008 = vpow2.f32 %v460_v63  ;;  %v1430_v32 = vadd.f32 %v1365_v55, %v305_v12  ;;  %v608_v34 = vmul.f32 1.442695, %v584_v15  ;;  %v362_v35 = vsub.f32 %v1387_v24, %v346_v16 }
 0x127   :  { %1010 = vpow2.f32 %v526_v1  ;;  %v1436_v37 = vadd.f32 %v1365_v55, %v310_v18  ;;  %v674_v38 = vmul.f32 1.442695, %v650_v20  ;;  %v579_v39 = vmul.f32 %v1377_v11, %v379_v6  ;;  %v166_v18 = vpop.f32.mrf.mxu0 }
 0x128   :  { %v1424_v26 = vpop.eup %986  ;;  %1012 = vpow2.f32 %v592_v54  ;;  %v416_v42 = vmul.f32 1.442695, %v397_v23  ;;  %v466_v43 = vmul.f32 1.442695, %v447_v25  ;;  %v645_v44 = vmul.f32 %v1380_v14, %v379_v6 }
 0x129   :  { %v1427_v31 = vpop.eup %988  ;;  %1014 = vpow2.f32 %v658_v13  ;;  %v532_v24 = vmul.f32 1.442695, %v513_v28  ;;  %v405_v47 = vmul.f32 %v1369_v3, %v387_v21  ;;  %v370_v49 = vsub.f32 %v1417_v8, %v354_v30 }
 0x12a   :  { %v1433_v36 = vpop.eup %990  ;;  %1016 = vpow2.f32 %v426_v19  ;;  %v455_v51 = vmul.f32 %v1372_v7, %v387_v21  ;;  %v521_v52 = vmul.f32 %v1374_v9, %v387_v21  ;;  %v378_v53 = vmax.f32 %v362_v35, 0.0 }
 0x12b   :  { %v1439_v40 = vpop.eup %992  ;;  %1018 = vpow2.f32 %v476_v22  ;;  %v1453_v58 = vadd.f32 %v1365_v55, %v315_v41  ;;  %v598_v59 = vmul.f32 1.442695, %v579_v39  ;;  %v349_v61 = vmul.f32 2.0, %v930_v45 }
 0x12c   :  { %v1442_v46 = vpop.eup %994  ;;  %1020 = vpow2.f32 %v542_v27  ;;  %v664_v63 = vmul.f32 1.442695, %v645_v44  ;;  %v587_v0 = vmul.f32 %v1377_v11, %v387_v21  ;;  %v1459_v2 = vadd.f32 %v1365_v55, %v320_v48 }
 0x12d   :  { %v1446_v50 = vpop.eup %996  ;;  %1022 = vpow2.f32 %v608_v34  ;;  %v432_v5 = vmul.f32 1.442695, %v405_v47  ;;  %v653_v6 = vmul.f32 %v1380_v14, %v387_v21  ;;  %v386_v8 = vmax.f32 %v370_v49, 0.0 }
 0x12e   :  { %v1450_v56 = vpop.eup %998  ;;  %1024 = vpow2.f32 %v674_v38  ;;  %v482_v10 = vmul.f32 1.442695, %v455_v51  ;;  %v548_v12 = vmul.f32 1.442695, %v521_v52  ;;  %v396_v13 = vmul.f32 %v1369_v3, %v378_v53  ;;  %v206_v52 = vpop.f32.mrf.mxu1 }
 0x12f   :  { %v1455_v62 = vpop.eup %1000  ;;  %1026 = vpow2.f32 %v416_v42  ;;  %v446_v55 = vmul.f32 %v1372_v7, %v378_v53  ;;  %v365_v16 = vsub.f32 %v1396_v33, %v349_v61  ;;  %v357_v17 = vmul.f32 2.0, %v942_v4 }
 0x130   :  { %v1461_v1 = vpop.eup %1002  ;;  %1028 = vpow2.f32 %v466_v43  ;;  %v614_v20 = vmul.f32 1.442695, %v587_v0  ;;  %v512_v21 = vmul.f32 %v1374_v9, %v378_v53  ;;  %v578_v22 = vmul.f32 %v1377_v11, %v378_v53 }
 0x131   :  { %v1464_v54 = vpop.eup %1004  ;;  %1030 = vpow2.f32 %v532_v24  ;;  %v680_v25 = vmul.f32 1.442695, %v653_v6  ;;  %v644_v27 = vmul.f32 %v1380_v14, %v378_v53  ;;  %v404_v28 = vmul.f32 %v1369_v3, %v386_v8  ;;  %v933_v6 = vpop.f32.mrf.mxu0 }
 0x132   :  { %v1467_v15 = vpop.eup %1006  ;;  %1032 = vpow2.f32 %v598_v59  ;;  %v414_v33 = vmul.f32 1.442695, %v396_v13  ;;  %v454_v34 = vmul.f32 %v1372_v7, %v386_v8  ;;  %v348_v35 = vmul.f32 2.0, %v166_v18 }
 0x133   :  { %v1471_v19 = vpop.eup %1008  ;;  %1034 = vpow2.f32 %v664_v63  ;;  %v464_v39 = vmul.f32 1.442695, %v446_v55  ;;  %v381_v41 = vmax.f32 %v365_v16, 0.0  ;;  %v373_v42 = vsub.f32 %v1436_v37, %v357_v17 }
 0x134   :  { %v1475_v23 = vpop.eup %1010  ;;  %1036 = vpow2.f32 %v432_v5  ;;  %v530_v44 = vmul.f32 1.442695, %v512_v21  ;;  %v596_v45 = vmul.f32 1.442695, %v578_v22  ;;  %v520_v24 = vmul.f32 %v1374_v9, %v386_v8 }
 0x135   :  { %v1479_v30 = vpop.eup %1012  ;;  %1038 = vpow2.f32 %v482_v10  ;;  %v662_v48 = vmul.f32 1.442695, %v644_v27  ;;  %v430_v49 = vmul.f32 1.442695, %v404_v28  ;;  %v586_v51 = vmul.f32 %v1377_v11, %v386_v8 }
 0x136   :  { %v1482_v38 = vpop.eup %1014  ;;  %1040 = vpow2.f32 %v548_v12  ;;  %v480_v59 = vmul.f32 1.442695, %v454_v34  ;;  %v652_v37 = vmul.f32 %v1380_v14, %v386_v8  ;;  %v364_v61 = vsub.f32 %v1392_v29, %v348_v35 }
 0x137   :  { %v1485_v43 = vpop.eup %1016  ;;  %1042 = vpow2.f32 %v614_v20  ;;  %v399_v0 = vmul.f32 %v1369_v3, %v381_v41  ;;  %v449_v4 = vmul.f32 %v1372_v7, %v381_v41  ;;  %v389_v5 = vmax.f32 %v373_v42, 0.0  ;;  %v945_v42 = vpop.f32.mrf.mxu1 }
 0x138   :  { %v1488_v47 = vpop.eup %1018  ;;  %1044 = vpow2.f32 %v680_v25  ;;  %v546_v12 = vmul.f32 1.442695, %v520_v24  ;;  %v515_v13 = vmul.f32 %v1374_v9, %v381_v41  ;;  %v356_v55 = vmul.f32 2.0, %v206_v52 }
 0x139   :  { %v1491_v53 = vpop.eup %1020  ;;  %1046 = vpow2.f32 %v414_v33  ;;  %v612_v29 = vmul.f32 1.442695, %v586_v51  ;;  %v581_v8 = vmul.f32 %v1377_v11, %v381_v41  ;;  %v647_v17 = vmul.f32 %v1380_v14, %v381_v41 }
 0x13a   :  { %1762 = vst [vmem:[#allocation8_spill] sm:$0xff] %v1491_v53  ;;  %v1495_v63 = vpop.eup %1022  ;;  %1048 = vpow2.f32 %v464_v39  ;;  %v678_v20 = vmul.f32 1.442695, %v652_v37  ;;  %v380_v21 = vmax.f32 %v364_v61, 0.0  ;;  %v351_v22 = vmul.f32 2.0, %v933_v6  ;;  %v216_v53 = vpop.f32.mrf.mxu1 }
 0x13b   :  { %1763 = vst [vmem:[#allocation9_spill] sm:$0xff] %v1495_v63  ;;  %v1499_v10 = vpop.eup %1024  ;;  %1050 = vpow2.f32 %v530_v44  ;;  %v420_v27 = vmul.f32 1.442695, %v399_v0  ;;  %v470_v28 = vmul.f32 1.442695, %v449_v4  ;;  %v407_v33 = vmul.f32 %v1369_v3, %v389_v5 }
 0x13c   :  { %1764 = vst [vmem:[#allocation10_spill] sm:$0xff] %v1499_v10  ;;  %v1502_v16 = vpop.eup %1026  ;;  %1052 = vpow2.f32 %v596_v45  ;;  %v536_v35 = vmul.f32 1.442695, %v515_v13  ;;  %v457_v39 = vmul.f32 %v1372_v7, %v389_v5  ;;  %v372_v41 = vsub.f32 %v1430_v32, %v356_v55 }
 0x13d   :  { %v1506_v18 = vpop.eup %1028  ;;  %1054 = vpow2.f32 %v662_v48  ;;  %v602_v45 = vmul.f32 1.442695, %v581_v8  ;;  %v668_v24 = vmul.f32 1.442695, %v647_v17  ;;  %v523_v48 = vmul.f32 %v1374_v9, %v389_v5 }
 0x13e   :  { %v1508_v25 = vpop.eup %1030  ;;  %1056 = vpow2.f32 %v430_v49  ;;  %v589_v51 = vmul.f32 %v1377_v11, %v389_v5  ;;  %v398_v52 = vmul.f32 %v1369_v3, %v380_v21  ;;  %v436_v32 = vmul.f32 1.442695, %v407_v33  ;;  %v176_v33 = vpop.f32.mrf.mxu0 }
 0x13f   :  { %v1511_v34 = vpop.eup %1032  ;;  %1058 = vpow2.f32 %v480_v59  ;;  %v367_v59 = vsub.f32 %v1411_v60, %v351_v22  ;;  %v448_v61 = vmul.f32 %v1372_v7, %v380_v21  ;;  %v359_v0 = vmul.f32 2.0, %v945_v42 }
 0x140   :  { %v1515_v44 = vpop.eup %1034  ;;  %1060 = vpow2.f32 %v546_v12  ;;  %v486_v6 = vmul.f32 1.442695, %v457_v39  ;;  %v655_v12 = vmul.f32 %v1380_v14, %v389_v5  ;;  %v1529_v13 = vmax.f32 %v372_v41, 0.0 }
 0x141   :  { %v1518_v49 = vpop.eup %1036  ;;  %1062 = vpow2.f32 %v612_v29  ;;  %v552_v29 = vmul.f32 1.442695, %v523_v48  ;;  %v514_v60 = vmul.f32 %v1374_v9, %v380_v21  ;;  %v580_v8 = vmul.f32 %v1377_v11, %v380_v21 }
 0x142   :  { %v1523_v37 = vpop.eup %1038  ;;  %1064 = vpow2.f32 %v678_v20  ;;  %v418_v20 = vmul.f32 1.442695, %v398_v52  ;;  %v646_v22 = vmul.f32 %v1380_v14, %v380_v21  ;;  %v618_v5 = vmul.f32 1.442695, %v589_v51 }
 0x143   :  { %v1526_v4 = vpop.eup %1040  ;;  %1066 = vpow2.f32 %v420_v27  ;;  %v383_v27 = vmax.f32 %v367_v59, 0.0  ;;  %v468_v41 = vmul.f32 1.442695, %v448_v61  ;;  %v375_v42 = vsub.f32 %v1459_v2, %v359_v0 }
 0x144   :  { %v1531_v55 = vpop.eup %1042  ;;  %1068 = vpow2.f32 %v470_v28  ;;  %v684_v48 = vmul.f32 1.442695, %v655_v12  ;;  %v406_v10 = vmul.f32 %v1369_v3, %v1529_v13  ;;  %v534_v21 = vmul.f32 1.442695, %v514_v60 }
 0x145   :  { %1765 = vst [vmem:[#allocation11_spill] sm:$0xff] %v1531_v55  ;;  %v1535_v17 = vpop.eup %1044  ;;  %1070 = vpow2.f32 %v536_v35  ;;  %v456_v35 = vmul.f32 %v1372_v7, %v1529_v13  ;;  %v600_v59 = vmul.f32 1.442695, %v580_v8  ;;  %v350_v63 = vmul.f32 2.0, %v176_v33 }
 0x146   :  { %1766 = vst [vmem:[#allocation12_spill] sm:$0xff] %v1535_v17  ;;  %v1047_v39 = vpop.eup %1046  ;;  %1072 = vpow2.f32 %v602_v45  ;;  %v666_v45 = vmul.f32 1.442695, %v646_v22  ;;  %v401_v2 = vmul.f32 %v1369_v3, %v383_v27  ;;  %v1551_v61 = vmul.f32 %v1374_v9, %v1529_v13 }
 0x147   :  { %v1049_v28 = vpop.eup %1048  ;;  %1074 = vpow2.f32 %v668_v24  ;;  %v451_v24 = vmul.f32 %v1372_v7, %v383_v27  ;;  %v1557_v0 = vmax.f32 %v375_v42, 0.0  ;;  %v434_v60 = vmul.f32 1.442695, %v406_v10 }
 0x148   :  { %v1051_v52 = vpop.eup %1050  ;;  %1076 = vpow2.f32 %v436_v32  ;;  %v1555_v32 = vmul.f32 %v1377_v11, %v1529_v13  ;;  %v1561_v8 = vmul.f32 1.442695, %v456_v35  ;;  %v583_v33 = vmul.f32 %v1377_v11, %v383_v27 }
 0x149   :  { %v1543_v17 = vpop.eup %1052  ;;  %1078 = vpow2.f32 %v418_v20  ;;  %v517_v20 = vmul.f32 %v1374_v9, %v383_v27  ;;  %v493_v42 = vadd.f32 %v1427_v31, %v1424_v26  ;;  %v474_v10 = vmul.f32 1.442695, %v451_v24 }
 0x14a   :  { %v1547_v51 = vpop.eup %1054  ;;  %1080 = vpow2.f32 %v468_v41  ;;  %v366_v41 = vsub.f32 %v1406_v57, %v350_v63  ;;  %v649_v35 = vmul.f32 %v1380_v14, %v383_v27  ;;  %v492_v57 = vadd.f32 %v1471_v19, %v1467_v15 }
 0x14b   :  { %v1559_v12 = vpop.eup %1056  ;;  %1082 = vpow2.f32 %v486_v6  ;;  %v424_v6 = vmul.f32 1.442695, %v401_v2  ;;  %v494_v63 = vadd.f32 %v1049_v28, %v1047_v39  ;;  %v540_v26 = vmul.f32 1.442695, %v517_v20 }
 0x14c   :  { %1767 = vst [vmem:[#allocation13_spill] sm:$0xff] %v1559_v12  ;;  %v1564_v22 = vpop.eup %1058  ;;  %1084 = vpow2.f32 %v552_v29  ;;  %v409_v29 = vmul.f32 %v1369_v3, %v1557_v0  ;;  %v459_v31 = vmul.f32 %v1372_v7, %v1557_v0  ;;  %v525_v27 = vmul.f32 %v1374_v9, %v1557_v0 }
 0x14d   :  { %1768 = vst [vmem:[#allocation14_spill] sm:$0xff] %v1564_v22  ;;  %v1570_v55 = vpop.eup %1060  ;;  %1086 = vpow2.f32 %v534_v21  ;;  %v358_v21 = vmul.f32 2.0, %v216_v53  ;;  %v559_v24 = vadd.f32 %v1433_v36, %v493_v42  ;;  %v606_v15 = vmul.f32 1.442695, %v583_v33 }
 0x14e   :  { %v1573_v12 = vpop.eup %1062  ;;  %1088 = vpow2.f32 %v618_v5  ;;  %v382_v5 = vmax.f32 %v366_v41, 0.0  ;;  %v672_v19 = vmul.f32 1.442695, %v649_v35  ;;  %v591_v39 = vmul.f32 %v1377_v11, %v1557_v0 }
 0x14f   :  { %1769 = vst [vmem:[#allocation15_spill] sm:$0xff] %v1573_v12  ;;  %v1579_v22 = vpop.eup %1064  ;;  %1090 = vpow2.f32 %v600_v59  ;;  %v440_v59 = vmul.f32 1.442695, %v409_v29  ;;  %v558_v20 = vadd.f32 %v1475_v23, %v492_v57  ;;  %v560_v53 = vadd.f32 %v1051_v52, %v494_v63  ;;  %v1600_v23 = vld [vmem:[%s1760_s6] ss:$0 sm:$0xff] }
 0x150   :  { %1770 = vst [vmem:[#allocation16_spill] sm:$0xff] %v1579_v22  ;;  %v1067_v2 = vpop.eup %1066  ;;  %1092 = vpow2.f32 %v684_v48  ;;  %v495_v48 = vadd.f32 %v1506_v18, %v1502_v16  ;;  %v490_v41 = vmul.f32 1.442695, %v459_v31  ;;  %v374_v36 = vsub.f32 %v1453_v58, %v358_v21 }
 0x151   :  { %v1069_v12 = vpop.eup %1068  ;;  %1094 = vpow2.f32 %v666_v45  ;;  %v625_v45 = vadd.f32 %v1439_v40, %v559_v24  ;;  %v556_v42 = vmul.f32 1.442695, %v525_v27  ;;  %v400_v35 = vmul.f32 %v1369_v3, %v382_v5 }
 0x152   :  { %v1071_v28 = vpop.eup %1070  ;;  %1096 = vpow2.f32 %v424_v6  ;;  %v450_v29 = vmul.f32 %v1372_v7, %v382_v5  ;;  %v516_v58 = vmul.f32 %v1374_v9, %v382_v5  ;;  %v582_v40 = vmul.f32 %v1377_v11, %v382_v5 }
 0x153   :  { %v1073_v22 = vpop.eup %1072  ;;  %1098 = vpow2.f32 %v474_v10  ;;  %v691_v18 = vadd.f32 %v1442_v46, %v625_v45  ;;  %v624_v6 = vadd.f32 %v1479_v30, %v558_v20  ;;  %v626_v10 = vadd.f32 %v1543_v17, %v560_v53 }
 0x154   :  { %v1593_v33 = vpop.eup %1074  ;;  %1100 = vpow2.f32 %v434_v60  ;;  %v561_v57 = vadd.f32 %v1508_v25, %v495_v48  ;;  %v1610_v31 = vmax.f32 %v374_v36, 0.0  ;;  %v497_v21 = vadd.f32 %v1069_v12, %v1067_v2 }
 0x155   :  { %v1602_v16 = vpop.eup %1076  ;;  %1102 = vpow2.f32 %v540_v26  ;;  %v714_v60 = vmul.f32 %v1600_v23, %v691_v18  ;;  %v422_v24 = vmul.f32 1.442695, %v400_v35  ;;  %v690_v46 = vadd.f32 %v1482_v38, %v624_v6 }
 0x156   :  { %v1079_v52 = vpop.eup %1078  ;;  %1104 = vpow2.f32 %v606_v15  ;;  %v692_v26 = vadd.f32 %v1547_v51, %v626_v10  ;;  %v472_v17 = vmul.f32 1.442695, %v450_v29  ;;  %v648_v25 = vmul.f32 %v1380_v14, %v382_v5 }
 0x157   :  { %v1081_v63 = vpop.eup %1080  ;;  %1106 = vpow2.f32 %v672_v19  ;;  %731 = vadd.xlane.f32.xlu1 %v714_v60  ;;  %v713_v12 = vmul.f32 %v1600_v23, %v690_v46  ;;  %v627_v2 = vadd.f32 %v1511_v34, %v561_v57  ;;  %v563_v19 = vadd.f32 %v1071_v28, %v497_v21 }
 0x158   :  { %v1613_v27 = vpop.eup %1082  ;;  %1108 = vpow2.f32 %v440_v59  ;;  %v496_v15 = vadd.f32 %v1081_v63, %v1079_v52  ;;  %v622_v38 = vmul.f32 1.442695, %v591_v39  ;;  %v408_v51 = vmul.f32 %v1369_v3, %v1610_v31 }
 0x159   :  { %v1617_v30 = vpop.eup %1084  ;;  %1110 = vpow2.f32 %v490_v41  ;;  %v538_v5 = vmul.f32 1.442695, %v516_v58  ;;  %v458_v41 = vmul.f32 %v1372_v7, %v1610_v31  ;;  %729 = vadd.xlane.f32.xlu0 %v713_v12  ;;  %v715_v36 = vmul.f32 %v1600_v23, %v692_v26 }
 0x15a   :  { %v1087_v20 = vpop.eup %1086  ;;  %1112 = vpow2.f32 %v1561_v8  ;;  %v604_v28 = vmul.f32 1.442695, %v582_v40  ;;  %v501_v8 = vadd.f32 %v1450_v56, %v1446_v50  ;;  %v670_v3 = vmul.f32 1.442695, %v648_v25 }
 0x15b   :  { %v1622_v53 = vpop.eup %1088  ;;  %v562_v59 = vadd.f32 %v1087_v20, %v496_v15  ;;  %1114 = vpow2.f32 %v556_v42  ;;  %v693_v42 = vadd.f32 %v1515_v44, %v627_v2  ;;  %v629_v35 = vadd.f32 %v1073_v22, %v563_v19 }
 0x15c   :  { %v1091_v48 = vpop.eup %1090  ;;  %1116 = vpow2.f32 %v422_v24  ;;  %v550_v29 = vmul.f32 1.442695, %v1551_v61  ;;  %v438_v7 = vmul.f32 1.442695, %v408_v51  ;;  %v657_v52 = vmul.f32 %v1380_v14, %v1557_v0  ;;  %v1771_v51 = vld [vmem:[#allocation11_spill] sm:$0xff] }
 0x15d   :  { %v1630_v34 = vpop.eup %1092  ;;  %v628_v45 = vadd.f32 %v1091_v48, %v562_v59  ;;  %1118 = vpow2.f32 %v472_v17  ;;  %v488_v40 = vmul.f32 1.442695, %v458_v41  ;;  %v524_v50 = vmul.f32 %v1374_v9, %v1610_v31  ;;  %733 = vadd.xlane.f32.xlu0 %v715_v36 }
 0x15e   :  { %v1095_v39 = vpop.eup %1094  ;;  %1120 = vpow2.f32 %v622_v38  ;;  %v567_v22 = vadd.f32 %v1455_v62, %v501_v8  ;;  %v503_v61 = vadd.f32 %v1523_v37, %v1518_v49  ;;  %v716_v0 = vmul.f32 %v1600_v23, %v693_v42 }
 0x15f   :  { %v694_v58 = vadd.f32 %v1095_v39, %v628_v45  ;;  %v1097_v18 = vpop.eup %1096  ;;  %1122 = vpow2.f32 %v538_v5  ;;  %v695_v10 = vadd.f32 %v1593_v33, %v629_v35  ;;  %v616_v9 = vmul.f32 1.442695, %v1555_v32  ;;  %v1772_v5 = vld [vmem:[#allocation8_spill] sm:$0xff]  ;;  %v1773_v45 = vld [vmem:[#allocation13_spill] sm:$0xff] }
 0x160   :  { %v1099_v56 = vpop.eup %1098  ;;  %1124 = vpow2.f32 %v604_v28  ;;  %v654_v62 = vmul.f32 %v1380_v14, %v1529_v13  ;;  %v688_v21 = vmul.f32 1.442695, %v657_v52  ;;  %v590_v24 = vmul.f32 %v1377_v11, %v1610_v31  ;;  %v1775_v35 = vld [vmem:[#allocation12_spill] sm:$0xff] }
 0x161   :  { %v717_v44 = vmul.f32 %v1600_v23, %v694_v58  ;;  %v1644_v6 = vpop.eup %1100  ;;  %1126 = vpow2.f32 %v670_v3  ;;  %v499_v57 = vadd.f32 %v1099_v56, %v1097_v18  ;;  %735 = vadd.xlane.f32.xlu0 %v716_v0  ;;  %v633_v33 = vadd.f32 %v1461_v1, %v567_v22  ;;  %v1776_v18 = vld [vmem:[#allocation9_spill] sm:$0xff] }
 0x162   :  { %v1103_v63 = vpop.eup %1102  ;;  %1128 = vpow2.f32 %v438_v7  ;;  %v569_v46 = vadd.f32 %v1526_v4, %v503_v61  ;;  %v554_v26 = vmul.f32 1.442695, %v524_v50  ;;  %v718_v17 = vmul.f32 %v1600_v23, %v695_v10 }
 0x163   :  { %737 = vadd.xlane.f32.xlu1 %v717_v44  ;;  %v1105_v60 = vpop.eup %1104  ;;  %1130 = vpow2.f32 %v488_v40  ;;  %v565_v49 = vadd.f32 %v1103_v63, %v499_v57  ;;  %v505_v13 = vadd.f32 %v1613_v27, %v1602_v16  ;;  %v500_v20 = vadd.f32 %v1488_v47, %v1485_v43  ;;  %v1777_v63 = vld [vmem:[#allocation10_spill] sm:$0xff] }
 0x164   :  { %v1107_v37 = vpop.eup %1106  ;;  %1132 = vpow2.f32 %v550_v29  ;;  %v682_v2 = vmul.f32 1.442695, %v654_v62  ;;  %v620_v4 = vmul.f32 1.442695, %v590_v24  ;;  %v656_v19 = vmul.f32 %v1380_v14, %v1610_v31  ;;  %v1774_v14 = vld [vmem:[#allocation14_spill] sm:$0xff] }
 0x165   :  { %v1109_v32 = vpop.eup %1108  ;;  %v631_v25 = vadd.f32 %v1105_v60, %v565_v49  ;;  %1134 = vpow2.f32 %v616_v9  ;;  %739 = vadd.xlane.f32.xlu0 %v718_v17  ;;  %v699_v38 = vadd.f32 %v1464_v54, %v633_v33  ;;  %v635_v59 = vadd.f32 %v1771_v51, %v569_v46 }
 0x166   :  { %v1111_v15 = vpop.eup %1110  ;;  %1136 = vpow2.f32 %v688_v21  ;;  %v571_v43 = vadd.f32 %v1617_v30, %v505_v13  ;;  %v566_v41 = vadd.f32 %v1772_v5, %v500_v20  ;;  %v502_v31 = vadd.f32 %v1774_v14, %v1773_v45  ;;  %v1778_v21 = vld [vmem:[#allocation15_spill] sm:$0xff] }
 0x167   :  { %v1113_v12 = vpop.eup %1112  ;;  %v697_v11 = vadd.f32 %v1107_v37, %v631_v25  ;;  %1138 = vpow2.f32 %v554_v26  ;;  %v507_v47 = vadd.f32 %v1111_v15, %v1109_v32  ;;  %v686_v8 = vmul.f32 1.442695, %v656_v19 }
 0x168   :  { %v1115_v1 = vpop.eup %1114  ;;  %1140 = vpow2.f32 %v682_v2  ;;  %v722_v39 = vmul.f32 %v1600_v23, %v699_v38  ;;  %v701_v30 = vadd.f32 %v1775_v35, %v635_v59  ;;  %v637_v29 = vadd.f32 %v1622_v53, %v571_v43  ;;  %v762_v59 = vld [vmem:[%s1759_s5] sm:$0xff] }
 0x169   :  { %v1117_v16 = vpop.eup %1116  ;;  %v720_v27 = vmul.f32 %v1600_v23, %v697_v11  ;;  %1142 = vpow2.f32 %v620_v4  ;;  %v573_v7 = vadd.f32 %v1115_v1, %v507_v47  ;;  %v632_v52 = vadd.f32 %v1776_v18, %v566_v41  ;;  %v764_v47 = vld [vmem:[%s1759_s5 + $0x10] sm:$0xff] }
 0x16a   :  { %v1119_v48 = vpop.eup %1118  ;;  %v568_v56 = vadd.f32 %v1570_v55, %v502_v31  ;;  %v504_v44 = vadd.f32 %v1113_v12, %v1644_v6  ;;  %1144 = vpow2.f32 %v686_v8  ;;  %v724_v10 = vmul.f32 %v1600_v23, %v701_v30  ;;  %v767_v30 = vld [vmem:[%s1759_s5 + $0x28] sm:$0xff] }
 0x16b   :  { %v1121_v36 = vpop.eup %1120  ;;  %v498_v28 = vadd.f32 %v1119_v48, %v1117_v16  ;;  %743 = vadd.xlane.f32.xlu0 %v720_v27  ;;  %v703_v57 = vadd.f32 %v1630_v34, %v637_v29  ;;  %v698_v9 = vadd.f32 %v1777_v63, %v632_v52  ;;  %v1779_v34 = vld [vmem:[#allocation16_spill] sm:$0xff]  ;;  %v763_v27 = vld [vmem:[%s1759_s5 + $0x8] sm:$0xff] }
 0x16c   :  { %v1123_v54 = vpop.eup %1122  ;;  %v639_v53 = vadd.f32 %v1121_v36, %v573_v7  ;;  %v634_v49 = vadd.f32 %v1778_v21, %v568_v56  ;;  %v769_v56 = vld [vmem:[%s1759_s5 + $0x38] sm:$0xff] }
 0x16d   :  { %v1125_v3 = vpop.eup %1124  ;;  %v564_v42 = vadd.f32 %v1123_v54, %v498_v28  ;;  %v726_v24 = vmul.f32 %v1600_v23, %v703_v57  ;;  %v721_v32 = vmul.f32 %v1600_v23, %v698_v9  ;;  %v771_v57 = vld [vmem:[%s1759_s5 + $0x48] sm:$0xff]  ;;  %v770_v9 = vld [vmem:[%s1759_s5 + $0x40] sm:$0xff] }
 0x16e   :  { %v1127_v58 = vpop.eup %1126  ;;  %v700_v26 = vadd.f32 %v1779_v34, %v634_v49 }
 0x16f   :  { %v1129_v40 = vpop.eup %1128  ;;  %v630_v50 = vadd.f32 %v1125_v3, %v564_v42  ;;  %747 = vadd.xlane.f32.xlu0 %v722_v39  ;;  %v766_v39 = vld [vmem:[%s1759_s5 + $0x20] sm:$0xff] }
 0x170   :  { %v1131_v22 = vpop.eup %1130  ;;  %v723_v12 = vmul.f32 %v1600_v23, %v700_v26 }
 0x171   :  { %v1133_v61 = vpop.eup %1132  ;;  %v696_v0 = vadd.f32 %v1127_v58, %v630_v50  ;;  %v506_v37 = vadd.f32 %v1131_v22, %v1129_v40  ;;  %v768_v22 = vld [vmem:[%s1759_s5 + $0x30] sm:$0xff] }
 0x172   :  { %v1135_v60 = vpop.eup %1134  ;;  %v570_v55 = vadd.f32 %v1133_v61, %v504_v44 }
 0x173   :  { %v719_v62 = vmul.f32 %v1600_v23, %v696_v0  ;;  %751 = vadd.xlane.f32.xlu0 %v724_v10  ;;  %v1137_v6 = vpop.eup %1136 }
 0x174   :  { %v705_v33 = vadd.f32 %v1137_v6, %v639_v53  ;;  %v1139_v46 = vpop.eup %1138  ;;  %v636_v17 = vadd.f32 %v1135_v60, %v570_v55 }
 0x175   :  { %741 = vadd.xlane.f32.xlu1 %v719_v62  ;;  %v572_v25 = vadd.f32 %v1139_v46, %v506_v37  ;;  %v1141_v13 = vpop.eup %1140  ;;  %v773_v37 = vld [vmem:[%s1759_s5 + $0x58] sm:$0xff] }
 0x176   :  { %v1143_v15 = vpop.eup %1142  ;;  %v728_v20 = vmul.f32 %v1600_v23, %v705_v33  ;;  %v702_v2 = vadd.f32 %v1141_v13, %v636_v17  ;;  %v772_v33 = vld [vmem:[%s1759_s5 + $0x50] sm:$0xff]  ;;  %v775_v13 = vld [vmem:[%s1759_s5 + $0x68] sm:$0xff] }
 0x177   :  { %755 = vadd.xlane.f32.xlu0 %v726_v24  ;;  %v638_v11 = vadd.f32 %v1143_v15, %v572_v25  ;;  %v1145_v1 = vpop.eup %1144 }
 0x178   :  { %v725_v4 = vmul.f32 %v1600_v23, %v702_v2 }
 0x179   :  { %745 = vadd.xlane.f32.xlu1 %v721_v32  ;;  %v704_v19 = vadd.f32 %v1145_v1, %v638_v11 }
 0x17b   :  { %759 = vadd.xlane.f32.xlu0 %v728_v20  ;;  %v727_v38 = vmul.f32 %v1600_v23, %v704_v19  ;;  %v765_v23 = vld [vmem:[%s1759_s5 + $0x18] sm:$0xff] }
 0x17d   :  { %749 = vadd.xlane.f32.xlu1 %v723_v12  ;;  %v774_v12 = vld [vmem:[%s1759_s5 + $0x60] sm:$0xff] }
 0x181   :  { %753 = vadd.xlane.f32.xlu1 %v725_v4 }
 0x185   :  { %757 = vadd.xlane.f32.xlu1 %v727_v38  ;;  %v777_v38 = vld [vmem:[%s1759_s5 + $0x78] sm:$0xff] }
 0x1e0   :  { %v732_v43 = vpop.xlane.xlu1 %731 }
 0x1e1   :  { %v779_v41 = vmul.f32 %v763_v27, %v732_v43  ;;  %v776_v27 = vld [vmem:[%s1759_s5 + $0x70] sm:$0xff] }
 0x1e2   :  { %v730_v51 = vpop.xlane.xlu0 %729 }
 0x1e3   :  { %v778_v48 = vmul.f32 %v762_v59, %v730_v51  ;;  %v796_v31 = vsel %vm794_vm0, %v779_v41, 0.0 }
 0x1e5   :  { %v795_v28 = vsel %vm794_vm0, %v778_v48, 0.0 }
 0x1e6   :  { %v734_v16 = vpop.xlane.xlu0 %733  ;;  %v797_v8 = vadd.f32 %v796_v31, %v795_v28 }
 0x1e7   :  { %v780_v36 = vmul.f32 %v764_v47, %v734_v16 }
 0x1e9   :  { %v798_v54 = vsel %vm794_vm0, %v780_v36, 0.0 }
 0x1ea   :  { %v736_v5 = vpop.xlane.xlu0 %735  ;;  %v799_v35 = vadd.f32 %v798_v54, %v797_v8 }
 0x1eb   :  { %v781_v45 = vmul.f32 %v765_v23, %v736_v5 }
 0x1ec   :  { %v738_v3 = vpop.xlane.xlu1 %737 }
 0x1ed   :  { %v800_v42 = vsel %vm794_vm0, %v781_v45, 0.0  ;;  %v782_v7 = vmul.f32 %v766_v39, %v738_v3 }
 0x1ee   :  { %v740_v14 = vpop.xlane.xlu0 %739  ;;  %v801_v58 = vadd.f32 %v800_v42, %v799_v35 }
 0x1ef   :  { %v783_v18 = vmul.f32 %v767_v30, %v740_v14  ;;  %v802_v40 = vsel %vm794_vm0, %v782_v7, 0.0 }
 0x1f0   :  { %v803_v50 = vadd.f32 %v802_v40, %v801_v58 }
 0x1f1   :  { %v804_v44 = vsel %vm794_vm0, %v783_v18, 0.0 }
 0x1f2   :  { %v805_v0 = vadd.f32 %v804_v44, %v803_v50 }
 0x1f4   :  { %v744_v29 = vpop.xlane.xlu0 %743 }
 0x1f5   :  { %v785_v61 = vmul.f32 %v769_v56, %v744_v29 }
 0x1f7   :  { %v808_v62 = vsel %vm794_vm0, %v785_v61, 0.0 }
 0x1f8   :  { %v748_v52 = vpop.xlane.xlu0 %747 }
 0x1f9   :  { %v787_v21 = vmul.f32 %v771_v57, %v748_v52 }
 0x1fb   :  { %v812_v34 = vsel %vm794_vm0, %v787_v21, 0.0 }
 0x1fc   :  { %v752_v53 = vpop.xlane.xlu0 %751 }
 0x1fd   :  { %v789_v26 = vmul.f32 %v773_v37, %v752_v53 }
 0x1fe   :  { %v742_v10 = vpop.xlane.xlu1 %741 }
 0x1ff   :  { %v784_v63 = vmul.f32 %v768_v22, %v742_v10  ;;  %v816_v11 = vsel %vm794_vm0, %v789_v26, 0.0 }
 0x200   :  { %v756_v46 = vpop.xlane.xlu0 %755 }
 0x201   :  { %v806_v60 = vsel %vm794_vm0, %v784_v63, 0.0  ;;  %v791_v1 = vmul.f32 %v775_v13, %v756_v46 }
 0x202   :  { %v807_v49 = vadd.f32 %v806_v60, %v805_v0  ;;  %v746_v55 = vpop.xlane.xlu1 %745 }
 0x203   :  { %v786_v6 = vmul.f32 %v770_v9, %v746_v55  ;;  %v820_v47 = vsel %vm794_vm0, %v791_v1, 0.0 }
 0x204   :  { %v809_v24 = vadd.f32 %v808_v62, %v807_v49  ;;  %v760_v51 = vpop.xlane.xlu0 %759 }
 0x205   :  { %v810_v32 = vsel %vm794_vm0, %v786_v6, 0.0  ;;  %v793_v48 = vmul.f32 %v777_v38, %v760_v51 }
 0x206   :  { %v811_v17 = vadd.f32 %v810_v32, %v809_v24  ;;  %v750_v25 = vpop.xlane.xlu1 %749 }
 0x207   :  { %v788_v15 = vmul.f32 %v772_v33, %v750_v25  ;;  %v824_v45 = vsel %vm794_vm0, %v793_v48, 0.0 }
 0x208   :  { %v813_v20 = vadd.f32 %v812_v34, %v811_v17 }
 0x209   :  { %v814_v2 = vsel %vm794_vm0, %v788_v15, 0.0 }
 0x20a   :  { %v815_v4 = vadd.f32 %v814_v2, %v813_v20  ;;  %v754_v19 = vpop.xlane.xlu1 %753 }
 0x20b   :  { %v790_v59 = vmul.f32 %v774_v12, %v754_v19 }
 0x20c   :  { %v817_v16 = vadd.f32 %v816_v11, %v815_v4 }
 0x20d   :  { %v818_v43 = vsel %vm794_vm0, %v790_v59, 0.0 }
 0x20e   :  { %v819_v23 = vadd.f32 %v818_v43, %v817_v16  ;;  %v758_v5 = vpop.xlane.xlu1 %757 }
 0x20f   :  { %v792_v41 = vmul.f32 %v776_v27, %v758_v5 }
 0x210   :  { %v821_v36 = vadd.f32 %v820_v47, %v819_v23 }
 0x211   :  { %v822_v28 = vsel %vm794_vm0, %v792_v41, 0.0 }
 0x212   :  { %v823_v14 = vadd.f32 %v822_v28, %v821_v36 }
 0x214   :  { %v825_v31 = vadd.f32 %v824_v45, %v823_v14 }
 0x216   :  { %826 = vadd.xlane.f32.xlu1 %v825_v31 }
 0x29f   :  { %v827_v54 = vpop.xlane.xlu1 %826 }
 0x2a0   :  { %v828_v8 = vrot.slane %v827_v54, 4 }
 0x2a2   :  { %v829_v39 = vadd.f32 %v828_v8, %v827_v54 }
 0x2a4   :  { %v830_v3 = vrot.slane %v829_v39, 2 }
 0x2a6   :  { %v831_v42 = vadd.f32 %v830_v3, %v829_v39 }
 0x2a8   :  { %v832_v35 = vrot.slane %v831_v42, 1 }
 0x2aa   :  { %v833_v30 = vadd.f32 %v832_v35, %v831_v42 }
 0x2ac   :  { %978 = vpush %v833_v30 }
 0x2dd   :  { %s979_s5 = spop %978 }
 0x2de   :  { %837 = sst [smem:[#allocation5]] %s979_s5 }
 0x2df   :  { %845 = dma.smem_to_hbm %s1172_s10, 16, %s1761_s7, [#allocation3]  }
 0x2e0   :  { %1168 = dma.done.wait [#allocation3], 16  }
 0x2e1   :  { %1169 = vsyncadd [#allocation3], 4294967280 }
 0x2e2   :  { %849 = sfence }
 0x2e3   :  { %850 = vsyncpa [#allocation3], 1 }
 0x2e4   :  { %851 = vsyncpa [#allocation4], 1 }

</bundles_post_ra>
